<compile_context>
chip_gen: v7x
topology: tpu7x:2x2x1
jax: 0.10.0
libtpu: 0.0.40
codegen_flags: <defaults>
</compile_context>

<pallas_src>
import functools

import jax
import jax.numpy as jnp
from jax.experimental import pallas as pl
from jax.experimental.pallas import tpu as pltpu


# ---------------------------------------------------------------------------
# Hardware-aware budgets (queried once at trace time, conservative fallbacks).
# ---------------------------------------------------------------------------
@functools.lru_cache(maxsize=1)
def _budgets():
    kind = ""
    try:
        kind = jax.devices()[0].device_kind.lower()
    except Exception:
        pass
    vmem_cap = None
    try:
        vmem_cap = int(pltpu.get_tpu_info().vmem_capacity_bytes)
    except Exception:
        pass

    two_cores = any(t in kind for t in ("v7", "tpu7", "v4", "v5p"))
    # Only use the big budget when we positively know this is a 128-MiB-VMEM
    # part (v5e/v6e); default is the conservative v7x-safe budget.
    big_vmem = (vmem_cap is not None and vmem_cap >= (96 << 20)
                and not any(t in kind for t in ("v7", "tpu7")))

    if big_vmem:                       # v5e / v6e: 128 MiB VMEM per core
        target_block = 8 << 20         # ~8 MiB x/out blocks
        vmem_limit_cap = 64 << 20
    else:                              # v7x (64 MiB VMEM) / unknown
        target_block = 5 << 20         # ~5 MiB blocks -> 4 buffers = 20 MiB
        vmem_limit_cap = 44 << 20
    max_single_block = (vmem_limit_cap - (4 << 20)) // 4
    return target_block, vmem_limit_cap, max_single_block, two_cores


def _choose_nb(n, per_item_bytes, target_bytes, two_cores):
    """Batches per grid step: ~target-sized blocks; even #steps on 2-core parts."""
    nb = max(1, int(target_bytes // max(1, per_item_bytes)))
    nb = min(nb, n)
    if two_cores and n >= 2:
        steps = -(-n // nb)
        if steps <= 1 or steps % 2 == 1:
            steps = 2 if steps <= 1 else steps + 1
            nb = max(1, -(-n // steps))
    return int(min(nb, n))


# ---------------------------------------------------------------------------
# Kernels
# ---------------------------------------------------------------------------
def _ca_fused_kernel(x_ref, w1t_ref, b1_ref, w2t_ref, b2_ref, o_ref, *, inv_len):
    # x: (NB, C, L)  w1t: (C, mid)  b1: (1, mid)  w2t: (mid, C)  b2: (1, C)
    x = x_ref[...]                                              # input dtype

    # Mean over L, accumulated in f32 without materializing an f32 copy.
    pooled = jnp.sum(x, axis=-1, dtype=jnp.float32) * inv_len   # (NB, C)

    # 1x1 Conv1d == channel matmul, batched over NB.
    h = jnp.dot(pooled, w1t_ref[...], preferred_element_type=jnp.float32)
    h = jnp.maximum(h + b1_ref[...], 0.0)                       # (NB, mid)
    y = jnp.dot(h, w2t_ref[...], preferred_element_type=jnp.float32)
    y = jax.nn.sigmoid(y + b2_ref[...])                         # (NB, C)

    # Channel-wise rescale broadcast over L, in the input dtype (bf16-friendly).
    o_ref[...] = x * y.astype(x.dtype)[:, :, None]


def _pool_kernel(x_ref, psum_ref, *, l_tile, length):
    # Accumulates sum over L into (NB, C, 1) f32; grid = (n_tiles, l_tiles),
    # L axis is the reduction ("arbitrary") axis.
    li = pl.program_id(1)

    @pl.when(li == 0)
    def _():
        psum_ref[...] = jnp.zeros_like(psum_ref)

    x = x_ref[...]                                              # (NB, C, TL)
    pos = li * l_tile + jax.lax.broadcasted_iota(jnp.int32, x.shape, 2)
    xz = jnp.where(pos < length, x, jnp.array(0, x.dtype))      # mask L tail
    psum_ref[...] += jnp.sum(xz, axis=-1, keepdims=True, dtype=jnp.float32)


def _rescale_kernel(x_ref, y_ref, o_ref):
    # x: (NB, C, TL), y: (NB, C, 1) already in x's dtype.
    o_ref[...] = x_ref[...] * y_ref[...]


# ---------------------------------------------------------------------------
# Wrapper
# ---------------------------------------------------------------------------
@functools.partial(jax.jit, static_argnames=("force_l_tile",))
def ca_layer(x, w1, b1, w2, b2, *, force_l_tile=None):
    """CALayer forward: out = x * sigmoid(W2 @ relu(W1 @ mean_L(x) + b1) + b2)."""
    N, C, L = x.shape
    mid = w1.shape[0]
    itemsize = jnp.dtype(x.dtype).itemsize
    target_block, vmem_cap_limit, max_single_block, two_cores = _budgets()

    # Pre-transpose weights / reshape biases: kernels do row-batched matmuls.
    w1t = w1.T.astype(jnp.float32)                 # (C, mid)
    w2t = w2.T.astype(jnp.float32)                 # (mid, C)
    b1r = b1.reshape(1, mid).astype(jnp.float32)
    b2r = b2.reshape(1, C).astype(jnp.float32)

    per_sample = C * L * itemsize
    use_split = (force_l_tile is not None) or (per_sample > max_single_block)

    if not use_split:
        # ---------- fused single-pass path: one read + one write of x ----------
        nb = _choose_nb(N, per_sample, target_block, two_cores)
        block_bytes = nb * per_sample
        weight_bytes = 2 * 4 * (2 * C * mid + mid + C)   # double-buffered f32 weights
        vmem_need = 4 * block_bytes + weight_bytes + (2 << 20)
        vmem_limit = int(min(max(vmem_need, 16 << 20), vmem_cap_limit))

        cost = pl.CostEstimate(
            flops=2 * N * C * L + 4 * N * C * mid,
            transcendentals=N * C,
            bytes_accessed=2 * N * C * L * itemsize)

        return pl.pallas_call(
            functools.partial(_ca_fused_kernel, inv_len=1.0 / L),
            out_shape=jax.ShapeDtypeStruct((N, C, L), x.dtype),
            grid_spec=pltpu.PrefetchScalarGridSpec(
                num_scalar_prefetch=0,
                grid=(pl.cdiv(N, nb),),
                in_specs=[
                    pl.BlockSpec((nb, C, L), lambda n: (n, 0, 0)),
                    pl.BlockSpec((C, mid), lambda n: (0, 0)),
                    pl.BlockSpec((1, mid), lambda n: (0, 0)),
                    pl.BlockSpec((mid, C), lambda n: (0, 0)),
                    pl.BlockSpec((1, C), lambda n: (0, 0)),
                ],
                out_specs=pl.BlockSpec((nb, C, L), lambda n: (n, 0, 0)),
            ),
            compiler_params=pltpu.CompilerParams(
                dimension_semantics=("parallel",),
                vmem_limit_bytes=vmem_limit),
            cost_estimate=cost,
        )(x, w1t, b1r, w2t, b2r)

    # ---------- L-tiled fallback: pool pass + tiny JAX glue + rescale pass ----------
    if force_l_tile is not None:
        tl = int(force_l_tile)
    else:
        tl = max(128, (target_block // max(1, C * itemsize)) // 128 * 128)
    if tl >= L:
        tl = L                                     # full-L block is always legal
    nb = max(1, int(target_block // max(1, C * tl * itemsize)))
    nb = min(nb, N)
    block_bytes = nb * C * tl * itemsize
    vmem_limit = int(min(max(4 * block_bytes + (2 << 20), 16 << 20), vmem_cap_limit))
    n_steps = pl.cdiv(N, nb)
    l_steps = pl.cdiv(L, tl)

    psum = pl.pallas_call(
        functools.partial(_pool_kernel, l_tile=tl, length=L),
        out_shape=jax.ShapeDtypeStruct((N, C, 1), jnp.float32),
        grid_spec=pltpu.PrefetchScalarGridSpec(
            num_scalar_prefetch=0,
            grid=(n_steps, l_steps),
            in_specs=[pl.BlockSpec((nb, C, tl), lambda i, l: (i, 0, l))],
            out_specs=pl.BlockSpec((nb, C, 1), lambda i, l: (i, 0, 0)),
        ),
        compiler_params=pltpu.CompilerParams(
            dimension_semantics=("parallel", "arbitrary"),
            vmem_limit_bytes=vmem_limit),
        cost_estimate=pl.CostEstimate(
            flops=N * C * L, transcendentals=0,
            bytes_accessed=N * C * L * itemsize + N * C * 4),
    )(x)

    # Tiny (N, C) squeeze-excite in plain JAX (negligible vs HBM traffic of x).
    pooled = psum[:, :, 0] * (1.0 / L)
    h = jnp.maximum(jnp.dot(pooled, w1t) + b1r, 0.0)
    y = jax.nn.sigmoid(jnp.dot(h, w2t) + b2r)
    y3 = y.astype(x.dtype)[:, :, None]              # (N, C, 1)

    return pl.pallas_call(
        _rescale_kernel,
        out_shape=jax.ShapeDtypeStruct((N, C, L), x.dtype),
        grid_spec=pltpu.PrefetchScalarGridSpec(
            num_scalar_prefetch=0,
            grid=(n_steps, l_steps),
            in_specs=[
                pl.BlockSpec((nb, C, tl), lambda i, l: (i, 0, l)),
                pl.BlockSpec((nb, C, 1), lambda i, l: (i, 0, 0)),
            ],
            out_specs=pl.BlockSpec((nb, C, tl), lambda i, l: (i, 0, l)),
        ),
        compiler_params=pltpu.CompilerParams(
            dimension_semantics=("parallel", "parallel"),
            vmem_limit_bytes=vmem_limit),
        cost_estimate=pl.CostEstimate(
            flops=N * C * L, transcendentals=0,
            bytes_accessed=2 * N * C * L * itemsize),
    )(x, y3)


# ---------------------------------------------------------------------------
# Parameter construction (weight_norm resolved here) and a pure-JAX reference.
# ---------------------------------------------------------------------------
def _weight_norm(v, g):
    # PyTorch weight_norm for Conv1d: norm over all dims except dim 0.
    norm = jnp.sqrt(jnp.sum(v * v, axis=tuple(range(1, v.ndim)), keepdims=True))
    return g.reshape((-1,) + (1,) * (v.ndim - 1)) * v / norm


def make_params(channel, reduction, key):
    mid = channel // reduction
    k = jax.random.split(key, 6)
    v1 = jax.random.normal(k[0], (mid, channel, 1), jnp.float32) * 0.3
    g1 = jax.random.uniform(k[1], (mid,), jnp.float32, 0.5, 1.5)
    b1 = jax.random.normal(k[2], (mid,), jnp.float32) * 0.1
    v2 = jax.random.normal(k[3], (channel, mid, 1), jnp.float32) * 0.3
    g2 = jax.random.uniform(k[4], (channel,), jnp.float32, 0.5, 1.5)
    b2 = jax.random.normal(k[5], (channel,), jnp.float32) * 0.1
    w1 = _weight_norm(v1, g1)[:, :, 0]          # (mid, C)
    w2 = _weight_norm(v2, g2)[:, :, 0]          # (C, mid)
    return w1, b1.reshape(mid, 1), w2, b2.reshape(channel, 1)


def ca_layer_ref(x, w1, b1, w2, b2):
    pooled = jnp.mean(x, axis=2, keepdims=True)                       # (N, C, 1)
    h = jnp.maximum(jnp.einsum("mc,ncl->nml", w1, pooled) + b1, 0.0)  # (N, mid, 1)
    y = jax.nn.sigmoid(jnp.einsum("cm,nml->ncl", w2, h) + b2)         # (N, C, 1)
    return x * y


if __name__ == "__main__":
    key = jax.random.PRNGKey(0)
    kx, kp, kx2, kx3 = jax.random.split(key, 4)

    C, reduction = 16, 8
    w1, b1, w2, b2 = make_params(C, reduction, kp)

    # Case 1: small aligned shape -> fused single-pass path.
    x = jax.random.normal(kx, (2, C, 128), jnp.float32)
    out = jax.block_until_ready(ca_layer(x, w1, b1, w2, b2))
    ref = ca_layer_ref(x, w1, b1, w2, b2)
    assert out.shape == x.shape
    assert jnp.allclose(out, ref, atol=1e-5, rtol=1e-5), "mismatch (case 1)"

    # Case 2: ragged N and L -- no pad / slice passes anymore, fused path.
    x2 = jax.random.normal(kx2, (5, C, 96), jnp.float32)
    out2 = jax.block_until_ready(ca_layer(x2, w1, b1, w2, b2))
    ref2 = ca_layer_ref(x2, w1, b1, w2, b2)
    assert out2.shape == x2.shape
    assert jnp.allclose(out2, ref2, atol=1e-5, rtol=1e-5), "mismatch (case 2)"

    # Case 3: force the L-tiled fallback (pool + rescale) with a ragged L tail.
    x3 = jax.random.normal(kx3, (3, C, 320), jnp.float32)
    out3 = jax.block_until_ready(ca_layer(x3, w1, b1, w2, b2, force_l_tile=128))
    ref3 = ca_layer_ref(x3, w1, b1, w2, b2)
    assert out3.shape == x3.shape
    assert jnp.allclose(out3, ref3, atol=1e-5, rtol=1e-5), "mismatch (case 3)"

    # Case 4: bf16 input (pool/matmuls in f32, rescale in bf16).
    xb = x.astype(jnp.bfloat16)
    outb = jax.block_until_ready(ca_layer(xb, w1, b1, w2, b2))
    refb = ca_layer_ref(xb.astype(jnp.float32), w1, b1, w2, b2)
    assert outb.shape == xb.shape
    assert jnp.allclose(outb.astype(jnp.float32), refb, atol=5e-2, rtol=5e-2), \
        "mismatch (case 4, bf16)"

    print("KERNEL_OK")
</pallas_src>

<mosaic_0001>
module attributes {stable_mosaic.version = 11 : i64} {
  func.func @_ca_fused_kernel(%arg0: i32, %arg1: memref<2x16x128xf32, #tpu.memory_space<vmem>>, %arg2: memref<16x2xf32, #tpu.memory_space<vmem>>, %arg3: memref<1x2xf32, #tpu.memory_space<vmem>>, %arg4: memref<2x16xf32, #tpu.memory_space<vmem>>, %arg5: memref<1x16xf32, #tpu.memory_space<vmem>>, %arg6: memref<2x16x128xf32, #tpu.memory_space<vmem>>) attributes {dimension_semantics = [#tpu.dimension_semantics<parallel>], iteration_bounds = array<i64: 1>, scalar_prefetch = 0 : i64, scratch_operands = 0 : i64, tpu.core_type = #tpu.core_type<tc>, window_params = [{transform_indices = @transform_0, window_bounds = array<i64: 2, 16, 128>}, {pipeline_mode = #tpu.pipeline_mode<synchronous>, transform_indices = @transform_1, window_bounds = array<i64: 16, 2>}, {pipeline_mode = #tpu.pipeline_mode<synchronous>, transform_indices = @transform_2, window_bounds = array<i64: 1, 2>}, {pipeline_mode = #tpu.pipeline_mode<synchronous>, transform_indices = @transform_3, window_bounds = array<i64: 2, 16>}, {pipeline_mode = #tpu.pipeline_mode<synchronous>, transform_indices = @transform_4, window_bounds = array<i64: 1, 16>}, {transform_indices = @transform_5, window_bounds = array<i64: 2, 16, 128>}]} {
    %c0 = arith.constant 0 : index
    %c0_0 = arith.constant 0 : index
    %c0_1 = arith.constant 0 : index
    %0 = vector.load %arg1[%c0, %c0_0, %c0_1] : memref<2x16x128xf32, #tpu.memory_space<vmem>>, vector<2x16x128xf32>
    %cst = arith.constant dense<0.000000e+00> : vector<2x16xf32>
    %1 = vector.multi_reduction <add>, %0, %cst [2] : vector<2x16x128xf32> to vector<2x16xf32>
    %cst_2 = arith.constant 7.812500e-03 : f32
    %2 = vector.broadcast %cst_2 : f32 to vector<2x16xf32>
    %3 = arith.mulf %1, %2 : vector<2x16xf32>
    %c0_3 = arith.constant 0 : index
    %c0_4 = arith.constant 0 : index
    %4 = vector.load %arg2[%c0_3, %c0_4] : memref<16x2xf32, #tpu.memory_space<vmem>>, vector<16x2xf32>
    %cst_5 = arith.constant dense<0.000000e+00> : vector<2x2xf32>
    %5 = tpu.matmul %3, %4, %cst_5 {dimension_numbers = #tpu.dot_dimension_numbers<[1], [0], [0], [1], [0, 0, 1, 1], [], []>} : vector<2x16xf32>, vector<16x2xf32>, vector<2x2xf32> -> vector<2x2xf32>
    %c0_6 = arith.constant 0 : index
    %c0_7 = arith.constant 0 : index
    %6 = vector.load %arg3[%c0_6, %c0_7] : memref<1x2xf32, #tpu.memory_space<vmem>>, vector<1x2xf32>
    %7 = vector.broadcast %6 : vector<1x2xf32> to vector<2x2xf32>
    %8 = arith.addf %5, %7 : vector<2x2xf32>
    %cst_8 = arith.constant 0.000000e+00 : f32
    %9 = vector.broadcast %cst_8 : f32 to vector<2x2xf32>
    %10 = arith.maximumf %8, %9 : vector<2x2xf32>
    %c0_9 = arith.constant 0 : index
    %c0_10 = arith.constant 0 : index
    %11 = vector.load %arg4[%c0_9, %c0_10] : memref<2x16xf32, #tpu.memory_space<vmem>>, vector<2x16xf32>
    %cst_11 = arith.constant dense<0.000000e+00> : vector<2x16xf32>
    %12 = tpu.matmul %10, %11, %cst_11 {dimension_numbers = #tpu.dot_dimension_numbers<[1], [0], [0], [1], [0, 0, 1, 1], [], []>} : vector<2x2xf32>, vector<2x16xf32>, vector<2x16xf32> -> vector<2x16xf32>
    %c0_12 = arith.constant 0 : index
    %c0_13 = arith.constant 0 : index
    %13 = vector.load %arg5[%c0_12, %c0_13] : memref<1x16xf32, #tpu.memory_space<vmem>>, vector<1x16xf32>
    %14 = vector.broadcast %13 : vector<1x16xf32> to vector<2x16xf32>
    %15 = arith.addf %12, %14 : vector<2x16xf32>
    %16 = arith.negf %15 : vector<2x16xf32>
    %17 = math.exp %16 : vector<2x16xf32>
    %cst_14 = arith.constant 1.000000e+00 : f32
    %18 = vector.broadcast %cst_14 : f32 to vector<2x16xf32>
    %19 = arith.addf %18, %17 : vector<2x16xf32>
    %20 = arith.divf %18, %19 : vector<2x16xf32>
    %21 = vector.shape_cast %20 : vector<2x16xf32> to vector<2x16x1xf32>
    %22 = vector.broadcast %21 : vector<2x16x1xf32> to vector<2x16x128xf32>
    %23 = arith.mulf %0, %22 : vector<2x16x128xf32>
    %c0_15 = arith.constant 0 : index
    %c0_16 = arith.constant 0 : index
    %c0_17 = arith.constant 0 : index
    %24 = vector.load %arg6[%c0_15, %c0_16, %c0_17] : memref<2x16x128xf32, #tpu.memory_space<vmem>>, vector<2x16x128xf32>
    tpu.vector_store %arg6[%c0_15, %c0_16, %c0_17], %23 {strides = array<i32>} : memref<2x16x128xf32, #tpu.memory_space<vmem>>, vector<2x16x128xf32>,
    return
  }
  func.func @transform_0(%arg0: i32) -> (i32, i32, i32) {
    %c0_i32 = arith.constant 0 : i32
    %c0_i32_0 = arith.constant 0 : i32
    %c0_i32_1 = arith.constant 0 : i32
    return %arg0, %c0_i32, %c0_i32_0 : i32, i32, i32
  }
  func.func @transform_1(%arg0: i32) -> (i32, i32) {
    %c0_i32 = arith.constant 0 : i32
    %c0_i32_0 = arith.constant 0 : i32
    %c0_i32_1 = arith.constant 0 : i32
    return %c0_i32, %c0_i32_0 : i32, i32
  }
  func.func @transform_2(%arg0: i32) -> (i32, i32) {
    %c0_i32 = arith.constant 0 : i32
    %c0_i32_0 = arith.constant 0 : i32
    %c0_i32_1 = arith.constant 0 : i32
    return %c0_i32, %c0_i32_0 : i32, i32
  }
  func.func @transform_3(%arg0: i32) -> (i32, i32) {
    %c0_i32 = arith.constant 0 : i32
    %c0_i32_0 = arith.constant 0 : i32
    %c0_i32_1 = arith.constant 0 : i32
    return %c0_i32, %c0_i32_0 : i32, i32
  }
  func.func @transform_4(%arg0: i32) -> (i32, i32) {
    %c0_i32 = arith.constant 0 : i32
    %c0_i32_0 = arith.constant 0 : i32
    %c0_i32_1 = arith.constant 0 : i32
    return %c0_i32, %c0_i32_0 : i32, i32
  }
  func.func @transform_5(%arg0: i32) -> (i32, i32, i32) {
    %c0_i32 = arith.constant 0 : i32
    %c0_i32_0 = arith.constant 0 : i32
    %c0_i32_1 = arith.constant 0 : i32
    return %arg0, %c0_i32, %c0_i32_0 : i32, i32, i32
  }
}

</mosaic_0001>

<bundles_post_ra>
// kernel: ca_layer.1
= control target key start
LH: loop header
LB: loop body
LE: loop exit
PB: predicated region body
PF: predicated region fallthrough
CT: control target
= control target key end

     0   :  { %s437_s0 = inlined_call_operand.vmem [shape: f32[2,16,128], index: 0, kind: input, shape index: {}]   ;;  %s438_s1 = inlined_call_operand.vmem [shape: f32[16,2], index: 1, kind: input, shape index: {}]   ;;  %s439_s2 = inlined_call_operand.vmem [shape: f32[1,2], index: 2, kind: input, shape index: {}]   ;;  %s440_s3 = inlined_call_operand.vmem [shape: f32[2,16], index: 3, kind: input, shape index: {}]   ;;  %s441_s4 = inlined_call_operand.vmem [shape: f32[1,16], index: 4, kind: input, shape index: {}]   ;;  %s442_s5 = inlined_call_operand.hbm [shape: f32[2,16,128], index: 5, kind: output, shape index: {}]  }
   0x1   :  { %v385_v0 = vld [vmem:[%s437_s0 + $0x10] sm:$0xff]  ;;  %v390_v1 = vld [vmem:[%s437_s0] sm:$0xff] }
   0x2   :  { %29 = vadd.xlane.f32.xlu1 %v385_v0  ;;  %25 = vadd.xlane.f32.xlu0 %v390_v1 }
   0x3   :  { %10 = vsyncpa [#allocation3], 0  ;;  %v397_v2 = vld [vmem:[%s437_s0 + $0x18] sm:$0xff]  ;;  %v402_v3 = vld [vmem:[%s437_s0 + $0x8] sm:$0xff]  ;;  %v346_v7 = vmov 0.0|0.0   ;;  %vm347_vm0 = vmmov 0   ;;  %v50_v9 = vlaneseq }
   0x4   :  { %v37_v4 = vld [vmem:[%s438_s1] sm:$0xff]  ;;  %v38_v5 = vld [vmem:[%s438_s1 + $0x8] sm:$0xff]  ;;  %309 = vmatprep.subr.bf16.mxu0 %v346_v7  ;;  %v348_v8 = vmov 0.0   ;;  %vm61_vm1 = vcmask 130112   ;;  %vm72_vm2 = vcmask 1041409   ;;  %vm74_vm3 = vcmask 130048  }
   0x5   :  { %v310_v6 = vpack.c.bf16 %v38_v5, %v37_v4  ;;  %301 = vmatprep.mubr.msk.f32.mxu0 %vm347_vm0, %v348_v8  ;;  %304 = vmatprep.subr.mxu1 %v348_v8  ;;  %v51_v10 = vand.u32 127, %v50_v9  ;;  %v53_v11 = vshrl.u32 %v50_v9, 7  ;;  %v148_v30 = vld [vmem:[%s440_s3] sm:$0x3]  ;;  %vm160_vm4 = vcmask 1041408  }
   0x6   :  { %31 = vadd.xlane.f32.xlu1 %v397_v2  ;;  %27 = vadd.xlane.f32.xlu0 %v402_v3  ;;  %v286_v31 = vld [vmem:[%s439_s2] ss:$0 sm:$0xff]  ;;  %vm156_vm5 = vcmask 15360   ;;  %s349_s2 = smov [#allocation2]  }
   0x7   :  { %311 = vmatpush3.bf16.msra.mxu0 %v310_v6  ;;  %306 = vmatprep.mubr.msk.f32.mxu1 %vm347_vm0, %v348_v8  ;;  %v56_v12 = vadd.s32 4294967288, %v51_v10  ;;  %v54_v15 = vsub.s32 %v51_v10, %v53_v11  ;;  %v288_v36 = vld [vmem:[%s441_s4] ss:$0 sm:$0xff]  ;;  %v242_v43 = vsub.s32 0, %v53_v11  ;;  %v253_v46 = vsub.s32 1, %v53_v11  ;;  %s275_s3 = sshll.u32 %s349_s2, 4  ;;  %s276_s3 = int_to_ptr.vmem [resolvable:$true] %s275_s3 }
   0x8   :  { %305 = vmatpush3.msk.msra.mxu1 %vm160_vm4, %v148_v30  ;;  %s322_s4 = scalar_lea.vmem %s276_s3, 512  ;;  %p327_p1 = scmp.lt.s32.totalorder %s276_s3, %s276_s3 }
   0x9   :  { %v59_v18 = vsub.s32 %v56_v12, %v53_v11  ;;  %p323_p0 = scmp.ne.s32.totalorder %s276_s3, %s322_s4  ;;  %p328_p2 = scmp.lt.s32.totalorder %s322_s4, %s322_s4 }
   0xb   :  { %p329_p3 = por %p328_p2, %p327_p1 }
   0xd   :  { %p330_p4 = pnand %p329_p3, %p323_p0 }
  0x8f   :  { %v30_v13 = vpop.xlane.xlu1 %29  ;;  %v26_v14 = vpop.xlane.xlu0 %25 }
  0x90   :  { %v35_v16 = vmul.f32 0.0078125, %v30_v13  ;;  %v33_v17 = vmul.f32 0.0078125, %v26_v14 }
  0x92   :  { %v66_v23 = vrot.slane %v35_v16, %v54_v15  ;;  %v55_v24 = vrot.slane %v33_v17, %v54_v15 }
  0x93   :  { %v32_v19 = vpop.xlane.xlu1 %31  ;;  %v28_v20 = vpop.xlane.xlu0 %27 }
  0x94   :  { %v36_v21 = vmul.f32 0.0078125, %v32_v19  ;;  %v34_v22 = vmul.f32 0.0078125, %v28_v20 }
  0x96   :  { %v70_v25 = vrot.slane %v36_v21, %v59_v18  ;;  %v60_v26 = vrot.slane %v34_v22, %v59_v18 }
  0x98   :  { %v62_v27 = vsel %vm61_vm1, %v60_v26, %v55_v24  ;;  %v71_v28 = vsel %vm61_vm1, %v70_v25, %v66_v23 }
  0x99   :  { %v73_v29 = vsel %vm72_vm2, %v71_v28, %v62_v27 }
  0x9a   :  { %302 = vmatmul.mubr.msk.f32.vlgmr.msra.gmra.mrb[0].mxu0 %vm74_vm3, %v73_v29 }
 0x16d   :  { %v143_v32 = vpop.f32.mrb[0].mxu0 }
 0x16e   :  { %v144_v33 = vadd.f32 %v286_v31, %v143_v32  ;;  %v303_v34 = vpop.f32.mrb[1].mxu0 }
 0x170   :  { %v147_v35 = vmax.f32 %v144_v33, 0.0 }
 0x172   :  { %307 = vmatmul.mubr.msk.f32.vlgmr.msra.gmra.mrb[0].mxu1 %vm156_vm5, %v147_v35 }
 0x245   :  { %v230_v37 = vpop.f32.mrb[0].mxu1 }
 0x246   :  { %v231_v38 = vadd.f32 %v288_v36, %v230_v37  ;;  %v308_v39 = vpop.f32.mrb[1].mxu1 }
 0x248   :  { %v291_v40 = vmul.f32 -1.442695, %v231_v38 }
 0x24a   :  { %318 = vpow2.f32 %v291_v40 }
 0x254   :  { %v319_v41 = vpop.eup %318 }
 0x255   :  { %v237_v42 = vadd.f32 1.0, %v319_v41 }
 0x257   :  { %320 = vrcp.f32 %v237_v42 }
 0x261   :  { %v321_v44 = vpop.eup %320 }
 0x262   :  { %v243_v45 = vrot.slane %v321_v44, %v242_v43  ;;  %v254_v47 = vrot.slane %v321_v44, %v253_v46 }
 0x264   :  { %249 = vbcast.lane.b32.xlu1 %v243_v45, 264  ;;  %245 = vbcast.lane.b32.xlu0 %v243_v45, 256 }
 0x268   :  { %256 = vbcast.lane.b32.xlu1 %v254_v47, 256 }
 0x26c   :  { %260 = vbcast.lane.b32.xlu1 %v254_v47, 264 }
 0x2d6   :  { %v250_v48 = vpop.permute.xlu1 %249  ;;  %v246_v49 = vpop.permute.xlu0 %245 }
 0x2d7   :  { %v263_v50 = vmul.f32 %v250_v48, %v402_v3  ;;  %v262_v51 = vmul.f32 %v246_v49, %v390_v1 }
 0x2d9   :  { %267 = vst [vmem:[#allocation2 + $0x8] sm:$0xff] %v263_v50  ;;  %266 = vst [vmem:[#allocation2] sm:$0xff] %v262_v51 }
 0x2da   :  { %v257_v52 = vpop.permute.xlu1 %256 }
 0x2db   :  { %v264_v53 = vmul.f32 %v257_v52, %v385_v0 }
 0x2dd   :  { %268 = vst [vmem:[#allocation2 + $0x10] sm:$0xff] %v264_v53 }
 0x2de   :  { %v261_v54 = vpop.permute.xlu1 %260 }
 0x2df   :  { %v265_v55 = vmul.f32 %v261_v54, %v397_v2 }
 0x2e1   :  { %269 = vst [vmem:[#allocation2 + $0x18] sm:$0xff] %v265_v55 }
 0x2e2   :  { %333 = shalt.err (!%p330_p4)
}
 0x2e3   :  { %s334_s11 = scalar_lea.hbm %s442_s5, 512 }
 0x2e4   :  { %p335_p5 = scmp.ne.s32.totalorder %s442_s5, %s334_s11  ;;  %p338_p6 = scmp.lt.u32.totalorder %s334_s11, %s442_s5 }
 0x2e6   :  { %p340_p7 = pnand %p338_p6, %p335_p5 }
 0x2e8   :  { %343 = shalt.err (!%p340_p7)
}
 0x2e9   :  { %s350_s16 = smov 128   ;;  %s351_s17 = smov 8  }
 0x2ea   :  { %281 = dma.vmem_to_hbm [thread:$0]  %s276_s3, 512, %s442_s5, [#allocation3], %s350_s16, %s350_s16, %s351_s17  }
 0x2eb   :  { %344 = dma.done.wait [#allocation3], 512  }
 0x2ec   :  { %345 = vsyncadd [#allocation3], 4294966784 }
 0x2ed   :  { %285 = vsyncpa [#allocation3], 1 }

</bundles_post_ra>
